<compile_context>
chip_gen: v6e
topology: v6e:2x2x1
jax: 0.10.0
libtpu: 0.0.40
codegen_flags: <defaults>
</compile_context>

<pallas_src>
import jax
import jax.numpy as jnp
from jax.experimental import pallas as pl
from jax.experimental.pallas import tpu as pltpu


def mlp_kernel(x_ref, w1_ref, b1_ref, w2t_ref, b2_ref, o_ref):
    # Cast x's VMEM tile to the MXU input dtype in-kernel (no-op for f32).
    # This replaces the old standalone XLA cast that cost a full extra HBM pass.
    x = x_ref[...].astype(w1_ref.dtype)
    # Layer 1 on the MXU, f32 accumulation; bias + ReLU in f32 on the VPU.
    h = jnp.dot(x, w1_ref[...], preferred_element_type=jnp.float32)
    h = jnp.maximum(h + b1_ref[...], 0.0)
    # Layer 2 in transposed space: out^T[c, m] = sum_h w2t[c, h] * h[m, h]
    # (contract the hidden dim of both operands). Output (out_feats, tile_rows)
    # keeps the big dim on lanes -> unmasked lane-dense stores, no padding of
    # the tiny out_feats=2 dim.
    # TODO(synk): if the MLIR/bundle dump shows an exposed per-step XLU relayout
    # of h for this contraction AND the upstream GNN can emit x as
    # (in_features, N) for free, switch to a fully transposed pipeline.
    out_t = jax.lax.dot_general(
        w2t_ref[...],
        h.astype(w2t_ref.dtype),
        dimension_numbers=(((1,), (1,)), ((), ())),
        preferred_element_type=jnp.float32,
    )
    o_ref[...] = (out_t + b2_ref[...]).astype(o_ref.dtype)


def prepare_classifier_params(w1, b1, w2, b2, compute_dtype=jnp.float32):
    """One-time parameter prep (hoisted out of the forward pass):
       - w1 cast to the matmul input dtype (f32 or bf16)
       - b1 reshaped to (1, hidden) for sublane broadcast, kept in f32
       - w2 transposed once to (out_feats, hidden) so the kernel can emit a
         lane-dense (out_feats, N) output; cast to the matmul input dtype
       - b2 reshaped to (out_feats, 1), kept in f32 (epilogue stays f32).
       Note: only the tiny weights carry the bf16 dtype; x is NOT pre-cast."""
    return (
        w1.astype(compute_dtype),
        b1.reshape(1, -1).astype(jnp.float32),
        w2.T.astype(compute_dtype),
        b2.reshape(-1, 1).astype(jnp.float32),
    )


def classifier_forward_t(x, params, *, max_tile_rows=8192):
    """Hot path. x: (N, in_feats) f32; params from prepare_classifier_params.
       Returns lane-dense transposed logits of shape (out_feats, N), f32.
       Consumers (argmax / logit diff / softmax over 2 classes) should read this
       layout directly — it avoids a separate transpose launch + HBM pass."""
    w1, b1_r, w2_t, b2_c = params
    N, in_feats = x.shape
    hidden = w1.shape[1]
    out_feats = w2_t.shape[0]

    # Tile sizing: single grid step whenever the whole problem fits; otherwise
    # 8192-row tiles (multiple of 128 so the transposed output stays lane-dense
    # and unmasked). 8192 x 64 f32 = 2 MiB per x tile (4 MiB double-buffered),
    # which amortizes the ~0.35 us/step grid overhead and stays well inside the
    # 32 MiB scoped VMEM budget that is safe on v5e/v6e/v7x alike (we do NOT go
    # "whole problem in one step" for very large N because of v7x's 64 MiB VMEM).
    if N <= max_tile_rows:
        tile_rows = N
    else:
        assert max_tile_rows % 128 == 0, "max_tile_rows must be a multiple of 128"
        tile_rows = max_tile_rows
    grid = (pl.cdiv(N, tile_rows),)

    return pl.pallas_call(
        mlp_kernel,
        out_shape=jax.ShapeDtypeStruct((out_feats, N), jnp.float32),
        grid_spec=pltpu.PrefetchScalarGridSpec(
            num_scalar_prefetch=0,
            grid=grid,
            in_specs=[
                pl.BlockSpec((tile_rows, in_feats), lambda i: (i, 0)),
                # Grid-invariant weights/biases: constant index_map => Pallas
                # elides re-DMA across grid steps.
                pl.BlockSpec((in_feats, hidden), lambda i: (0, 0)),
                pl.BlockSpec((1, hidden), lambda i: (0, 0)),
                pl.BlockSpec((out_feats, hidden), lambda i: (0, 0)),
                pl.BlockSpec((out_feats, 1), lambda i: (0, 0)),
            ],
            out_specs=pl.BlockSpec((out_feats, tile_rows), lambda i: (0, i)),
        ),
        compiler_params=pltpu.CompilerParams(
            # Row tiles are independent. On v7x, if "parallel" alone does not
            # shard this axis across the 2 TensorCores (check the bundle dump),
            # switch to pltpu.CORE_PARALLEL; kept as "parallel" here so the
            # kernel lowers cleanly on every generation.
            dimension_semantics=("parallel",),
            # Explicit budget: above v5e's 16 MiB scoped default, well under
            # v7x's 64 MiB physical VMEM (don't raise past ~48 MiB there).
            vmem_limit_bytes=32 * 1024 * 1024,
        ),
    )(x, w1, b1_r, w2_t, b2_c)


def classifier_forward(x, params, *, max_tile_rows=8192):
    """Drop-in parity with the PyTorch module: returns (N, out_feats) f32 logits.
       Prefer classifier_forward_t in pipelines — the .T here is a separate XLA
       op (extra launch + extra HBM pass) kept only for API compatibility."""
    return classifier_forward_t(x, params, max_tile_rows=max_tile_rows).T


def _torch_linear_init(key, fan_in, fan_out, dtype=jnp.float32):
    """Deterministic init mimicking torch.nn.Linear default (uniform +-1/sqrt(fan_in))."""
    kw, kb = jax.random.split(key)
    bound = 1.0 / jnp.sqrt(jnp.array(fan_in, dtype=dtype))
    w = jax.random.uniform(kw, (fan_in, fan_out), dtype, -bound, bound)
    b = jax.random.uniform(kb, (fan_out,), dtype, -bound, bound)
    return w, b


if __name__ == "__main__":
    key = jax.random.PRNGKey(0)
    k_x, k_l1, k_l2 = jax.random.split(key, 3)

    num_nodes = 128       # rows (edge-pair embeddings fed to the classifier)
    in_features = 64      # concatenated node-embedding size
    hidden_feats = 32     # args.hidden_feats
    out_features = 2      # binary-edge logits

    x = jax.random.normal(k_x, (num_nodes, in_features), dtype=jnp.float32)
    w1, b1 = _torch_linear_init(k_l1, in_features, hidden_feats)
    w2, b2 = _torch_linear_init(k_l2, hidden_feats, out_features)

    # Pure-JAX reference of the fused MLP.
    ref = jnp.maximum(x @ w1 + b1, 0.0) @ w2 + b2

    # --- f32 path: single grid step, lane-dense (2, N) output (exact check) ---
    params_f32 = prepare_classifier_params(w1, b1, w2, b2, jnp.float32)
    logits_t = jax.block_until_ready(classifier_forward_t(x, params_f32))
    assert logits_t.shape == (out_features, num_nodes)
    assert jnp.allclose(logits_t, ref.T, atol=1e-5, rtol=1e-5)

    # Compatibility wrapper: PyTorch-style (N, out_feats).
    logits = jax.block_until_ready(classifier_forward(x, params_f32))
    assert logits.shape == (num_nodes, out_features)
    assert jnp.allclose(logits, ref, atol=1e-5, rtol=1e-5)

    # --- bf16 MXU-input path: weights bf16, x stays f32 in HBM and is cast to
    #     bf16 on the VMEM tile inside the kernel (no extra HBM pass). ---
    params_bf16 = prepare_classifier_params(w1, b1, w2, b2, jnp.bfloat16)
    logits_t_bf16 = jax.block_until_ready(classifier_forward_t(x, params_bf16))
    assert logits_t_bf16.shape == (out_features, num_nodes)
    assert jnp.allclose(logits_t_bf16, ref.T, atol=1e-1, rtol=1e-1)

    # --- multi-tile + ragged last tile: exercises the row grid and Pallas's
    #     masked output writeback (2nd tile covers only 1000 - 512 = 488 rows).
    n_big = 1000
    x_big = jax.random.normal(jax.random.PRNGKey(1), (n_big, in_features),
                              dtype=jnp.float32)
    ref_big = jnp.maximum(x_big @ w1 + b1, 0.0) @ w2 + b2
    logits_big_t = jax.block_until_ready(
        classifier_forward_t(x_big, params_f32, max_tile_rows=512))
    assert logits_big_t.shape == (out_features, n_big)
    assert jnp.allclose(logits_big_t, ref_big.T, atol=1e-5, rtol=1e-5)

    print("KERNEL_OK")
</pallas_src>

<mosaic_0001>
module attributes {stable_mosaic.version = 11 : i64} {
  func.func @mlp_kernel(%arg0: i32, %arg1: memref<128x64xf32, #tpu.memory_space<vmem>>, %arg2: memref<64x32xf32, #tpu.memory_space<vmem>>, %arg3: memref<1x32xf32, #tpu.memory_space<vmem>>, %arg4: memref<2x32xf32, #tpu.memory_space<vmem>>, %arg5: memref<2x1xf32, #tpu.memory_space<vmem>>, %arg6: memref<2x128xf32, #tpu.memory_space<vmem>>) attributes {dimension_semantics = [#tpu.dimension_semantics<parallel>], iteration_bounds = array<i64: 1>, scalar_prefetch = 0 : i64, scratch_operands = 0 : i64, tpu.core_type = #tpu.core_type<tc>, window_params = [{transform_indices = @transform_0, window_bounds = array<i64: 128, 64>}, {pipeline_mode = #tpu.pipeline_mode<synchronous>, transform_indices = @transform_1, window_bounds = array<i64: 64, 32>}, {pipeline_mode = #tpu.pipeline_mode<synchronous>, transform_indices = @transform_2, window_bounds = array<i64: 1, 32>}, {pipeline_mode = #tpu.pipeline_mode<synchronous>, transform_indices = @transform_3, window_bounds = array<i64: 2, 32>}, {pipeline_mode = #tpu.pipeline_mode<synchronous>, transform_indices = @transform_4, window_bounds = array<i64: 2, 1>}, {transform_indices = @transform_5, window_bounds = array<i64: 2, 128>}]} {
    %c0 = arith.constant 0 : index
    %c0_0 = arith.constant 0 : index
    %0 = vector.load %arg1[%c0, %c0_0] : memref<128x64xf32, #tpu.memory_space<vmem>>, vector<128x64xf32>
    %c0_1 = arith.constant 0 : index
    %c0_2 = arith.constant 0 : index
    %1 = vector.load %arg2[%c0_1, %c0_2] : memref<64x32xf32, #tpu.memory_space<vmem>>, vector<64x32xf32>
    %cst = arith.constant dense<0.000000e+00> : vector<128x32xf32>
    %2 = tpu.matmul %0, %1, %cst {dimension_numbers = #tpu.dot_dimension_numbers<[1], [0], [0], [1], [0, 0, 1, 1], [], []>} : vector<128x64xf32>, vector<64x32xf32>, vector<128x32xf32> -> vector<128x32xf32>
    %c0_3 = arith.constant 0 : index
    %c0_4 = arith.constant 0 : index
    %3 = vector.load %arg3[%c0_3, %c0_4] : memref<1x32xf32, #tpu.memory_space<vmem>>, vector<1x32xf32>
    %4 = vector.broadcast %3 : vector<1x32xf32> to vector<128x32xf32>
    %5 = arith.addf %2, %4 : vector<128x32xf32>
    %cst_5 = arith.constant 0.000000e+00 : f32
    %6 = vector.broadcast %cst_5 : f32 to vector<128x32xf32>
    %7 = arith.maximumf %5, %6 : vector<128x32xf32>
    %c0_6 = arith.constant 0 : index
    %c0_7 = arith.constant 0 : index
    %8 = vector.load %arg4[%c0_6, %c0_7] : memref<2x32xf32, #tpu.memory_space<vmem>>, vector<2x32xf32>
    %cst_8 = arith.constant dense<0.000000e+00> : vector<2x128xf32>
    %9 = tpu.matmul %8, %7, %cst_8 {dimension_numbers = #tpu.dot_dimension_numbers<[1], [1], [0], [0], [0, 0, 1, 0], [], []>} : vector<2x32xf32>, vector<128x32xf32>, vector<2x128xf32> -> vector<2x128xf32>
    %c0_9 = arith.constant 0 : index
    %c0_10 = arith.constant 0 : index
    %10 = vector.load %arg5[%c0_9, %c0_10] : memref<2x1xf32, #tpu.memory_space<vmem>>, vector<2x1xf32>
    %11 = vector.broadcast %10 : vector<2x1xf32> to vector<2x128xf32>
    %12 = arith.addf %9, %11 : vector<2x128xf32>
    %c0_11 = arith.constant 0 : index
    %c0_12 = arith.constant 0 : index
    %13 = vector.load %arg6[%c0_11, %c0_12] : memref<2x128xf32, #tpu.memory_space<vmem>>, vector<2x128xf32>
    tpu.vector_store %arg6[%c0_11, %c0_12], %12 {strides = array<i32>} : memref<2x128xf32, #tpu.memory_space<vmem>>, vector<2x128xf32>,
    return
  }
  func.func @transform_0(%arg0: i32) -> (i32, i32) {
    %c0_i32 = arith.constant 0 : i32
    %c0_i32_0 = arith.constant 0 : i32
    return %arg0, %c0_i32 : i32, i32
  }
  func.func @transform_1(%arg0: i32) -> (i32, i32) {
    %c0_i32 = arith.constant 0 : i32
    %c0_i32_0 = arith.constant 0 : i32
    %c0_i32_1 = arith.constant 0 : i32
    return %c0_i32, %c0_i32_0 : i32, i32
  }
  func.func @transform_2(%arg0: i32) -> (i32, i32) {
    %c0_i32 = arith.constant 0 : i32
    %c0_i32_0 = arith.constant 0 : i32
    %c0_i32_1 = arith.constant 0 : i32
    return %c0_i32, %c0_i32_0 : i32, i32
  }
  func.func @transform_3(%arg0: i32) -> (i32, i32) {
    %c0_i32 = arith.constant 0 : i32
    %c0_i32_0 = arith.constant 0 : i32
    %c0_i32_1 = arith.constant 0 : i32
    return %c0_i32, %c0_i32_0 : i32, i32
  }
  func.func @transform_4(%arg0: i32) -> (i32, i32) {
    %c0_i32 = arith.constant 0 : i32
    %c0_i32_0 = arith.constant 0 : i32
    %c0_i32_1 = arith.constant 0 : i32
    return %c0_i32, %c0_i32_0 : i32, i32
  }
  func.func @transform_5(%arg0: i32) -> (i32, i32) {
    %c0_i32 = arith.constant 0 : i32
    %c0_i32_0 = arith.constant 0 : i32
    return %c0_i32, %arg0 : i32, i32
  }
}

</mosaic_0001>

<bundles_post_ra>
// kernel: tpu_custom_call.1
= control target key start
LH: loop header
LB: loop body
LE: loop exit
PB: predicated region body
PF: predicated region fallthrough
CT: control target
= control target key end

     0   :  { %vm52_vm0 = vcmask 523264   ;;  %s760_s0 = inlined_call_operand.vmem [shape: f32[128,64], index: 0, kind: input, shape index: {}]   ;;  %s761_s1 = inlined_call_operand.vmem [shape: f32[64,32], index: 1, kind: input, shape index: {}]   ;;  %s762_s2 = inlined_call_operand.vmem [shape: f32[1,32], index: 2, kind: input, shape index: {}]   ;;  %s763_s3 = inlined_call_operand.vmem [shape: f32[2,32], index: 3, kind: input, shape index: {}]   ;;  %s764_s4 = inlined_call_operand.vmem [shape: f32[2,1], index: 4, kind: input, shape index: {}]   ;;  %s765_s5 = inlined_call_operand.hbm [shape: f32[2,128], index: 5, kind: output, shape index: {}]  }
   0x1   :  { %v44_v0 = vld [vmem:[%s761_s1 + $0x38] sm:$0xff]  ;;  %v43_v1 = vld [vmem:[%s761_s1 + $0x30] sm:$0xff]  ;;  %v42_v2 = vld [vmem:[%s761_s1 + $0x28] sm:$0xff] }
   0x2   :  { %481 = vmatprep.subr.mxu0 %v44_v0  ;;  %v21_v3 = vld [vmem:[%s760_s0] sm:$0xff]  ;;  %v40_v5 = vld [vmem:[%s761_s1 + $0x18] sm:$0xff]  ;;  %v39_v6 = vld [vmem:[%s761_s1 + $0x10] sm:$0xff] }
   0x3   :  { %482 = vmatpush3.msra.mxu0 %v44_v0  ;;  %497 = vmatprep.mubr.msk.f32.mxu0 %vm52_vm0, %v21_v3  ;;  %v41_v4 = vld [vmem:[%s761_s1 + $0x20] sm:$0xff] }
   0x4   :  { %483 = vmatprep.subr.mxu0 %v43_v1 }
   0x5   :  { %484 = vmatpush3.msra.mxu0 %v43_v1 }
   0x6   :  { %485 = vmatprep.subr.mxu0 %v42_v2 }
   0x7   :  { %486 = vmatpush3.msra.mxu0 %v42_v2 }
   0x8   :  { %487 = vmatprep.subr.mxu0 %v41_v4 }
   0x9   :  { %488 = vmatpush3.msra.mxu0 %v41_v4 }
   0xa   :  { %10 = vsyncpa [#allocation3], 0  ;;  %489 = vmatprep.subr.mxu0 %v40_v5  ;;  %v38_v7 = vld [vmem:[%s761_s1 + $0x8] sm:$0xff]  ;;  %v37_v8 = vld [vmem:[%s761_s1] sm:$0xff]  ;;  %v583_v24 = vmov 0.0   ;;  %vm584_vm1 = vmmov 0  }
   0xb   :  { %490 = vmatpush3.msra.mxu0 %v40_v5  ;;  %v22_v9 = vld [vmem:[%s760_s0 + $0x8] sm:$0xff]  ;;  %v23_v10 = vld [vmem:[%s760_s0 + $0x10] sm:$0xff]  ;;  %v24_v11 = vld [vmem:[%s760_s0 + $0x18] sm:$0xff]  ;;  %521 = vmatprep.subr.mxu1 %v583_v24  ;;  %v585_v26 = vmov 0   ;;  %vm269_vm2 = vcmask 261120   ;;  %s586_s17 = smov [#allocation2]  }
   0xc   :  { %491 = vmatprep.subr.mxu0 %v39_v6  ;;  %v25_v12 = vld [vmem:[%s760_s0 + $0x20] sm:$0xff]  ;;  %v26_v13 = vld [vmem:[%s760_s0 + $0x28] sm:$0xff]  ;;  %v27_v14 = vld [vmem:[%s760_s0 + $0x30] sm:$0xff]  ;;  %553 = vmatprep.mubr.msk.f32.mxu1 %vm584_vm1, %v583_v24  ;;  %s398_s18 = sshll.u32 %s586_s17, 4  ;;  %s399_s18 = int_to_ptr.vmem [resolvable:$true] %s398_s18 }
   0xd   :  { %492 = vmatpush3.msra.mxu0 %v39_v6  ;;  %v28_v15 = vld [vmem:[%s760_s0 + $0x38] sm:$0xff]  ;;  %v29_v16 = vld [vmem:[%s760_s0 + $0x40] sm:$0xff]  ;;  %v30_v17 = vld [vmem:[%s760_s0 + $0x48] sm:$0xff]  ;;  %560 = vset.pattern.permute.xlu0 %v585_v26  ;;  %s561_s19 = scalar_lea.vmem %s399_s18, 32  ;;  %p566_p1 = scmp.lt.s32.totalorder %s399_s18, %s399_s18 }
   0xe   :  { %493 = vmatprep.subr.mxu0 %v38_v7  ;;  %v31_v18 = vld [vmem:[%s760_s0 + $0x50] sm:$0xff]  ;;  %v32_v19 = vld [vmem:[%s760_s0 + $0x58] sm:$0xff]  ;;  %v33_v20 = vld [vmem:[%s760_s0 + $0x60] sm:$0xff]  ;;  %p562_p0 = scmp.ne.s32.totalorder %s399_s18, %s561_s19  ;;  %p567_p2 = scmp.lt.s32.totalorder %s561_s19, %s561_s19 }
   0xf   :  { %494 = vmatpush3.msra.mxu0 %v38_v7  ;;  %v34_v21 = vld [vmem:[%s760_s0 + $0x68] sm:$0xff]  ;;  %v35_v22 = vld [vmem:[%s760_s0 + $0x70] sm:$0xff]  ;;  %v36_v23 = vld [vmem:[%s760_s0 + $0x78] sm:$0xff] }
  0x10   :  { %495 = vmatprep.subr.mxu0 %v37_v8  ;;  %v263_v25 = vld [vmem:[%s764_s4] sm:$0x3]  ;;  %p568_p3 = por %p567_p2, %p566_p1 }
  0x11   :  { %496 = vmatpush3.msra.mxu0 %v37_v8  ;;  %266 = vperm.xlu0 %560, %v263_v25   ;;  %v406_v41 = vld [vmem:[%s762_s2] ss:$0 sm:$0xff] }
  0x12   :  { %498 = vmatmul.mubr.msk.f32.vlgmr.msra.gmra.mxu0 %vm52_vm0, %v22_v9  ;;  %p569_p4 = pnand %p568_p3, %p562_p0 }
  0x13   :  { %500 = vmatprep.mubr.msk.f32.mxu0 %vm52_vm0, %v23_v10 }
  0x16   :  { %501 = vmatmul.mubr.msk.f32.gmra.mxu0 %vm52_vm0, %v24_v11 }
  0x17   :  { %503 = vmatprep.mubr.msk.f32.mxu0 %vm52_vm0, %v25_v12  ;;  %v262_v12 = vld [vmem:[%s763_s3] sm:$0x3] }
  0x1a   :  { %504 = vmatmul.mubr.msk.f32.gmra.mxu0 %vm52_vm0, %v26_v13 }
  0x1b   :  { %506 = vmatprep.mubr.msk.f32.mxu0 %vm52_vm0, %v27_v14 }
  0x1e   :  { %507 = vmatmul.mubr.msk.f32.gmra.mxu0 %vm52_vm0, %v28_v15 }
  0x1f   :  { %509 = vmatprep.mubr.msk.f32.mxu0 %vm52_vm0, %v29_v16 }
  0x22   :  { %510 = vmatmul.mubr.msk.f32.gmra.mxu0 %vm52_vm0, %v30_v17 }
  0x23   :  { %512 = vmatprep.mubr.msk.f32.mxu0 %vm52_vm0, %v31_v18 }
  0x26   :  { %513 = vmatmul.mubr.msk.f32.gmra.mxu0 %vm52_vm0, %v32_v19 }
  0x27   :  { %515 = vmatprep.mubr.msk.f32.mxu0 %vm52_vm0, %v33_v20 }
  0x2a   :  { %516 = vmatmul.mubr.msk.f32.gmra.mxu0 %vm52_vm0, %v34_v21 }
  0x2b   :  { %518 = vmatprep.mubr.msk.f32.mxu0 %vm52_vm0, %v35_v22 }
  0x2e   :  { %519 = vmatmul.mubr.msk.f32.gmra.mxu0 %vm52_vm0, %v36_v23 }
  0x8c   :  { %v267_v13 = vpop.permute.xlu0 %266 }
  0xd2   :  { %v710_v27 = vpop.f32.mrf.mxu0 }
  0xd3   :  { %v173_v7 = vadd.f32 %v710_v27, %v406_v41 }
  0xd4   :  { %v712_v28 = vpop.f32.mrf.mxu0 }
  0xd5   :  { %v247_v9 = vmax.f32 %v173_v7, 0.0  ;;  %v168_v10 = vadd.f32 %v406_v41, %v712_v28 }
  0xd6   :  { %v502_v29 = vpop.f32.mrf.mxu0 }
  0xd7   :  { %v183_v3 = vadd.f32 %v502_v29, %v406_v41  ;;  %v246_v11 = vmax.f32 %v168_v10, 0.0 }
  0xd8   :  { %v714_v30 = vpop.f32.mrf.mxu0 }
  0xd9   :  { %v249_v5 = vmax.f32 %v183_v3, 0.0  ;;  %v178_v6 = vadd.f32 %v406_v41, %v714_v30 }
  0xda   :  { %v505_v31 = vpop.f32.mrf.mxu0 }
  0xdb   :  { %v193_v63 = vadd.f32 %v505_v31, %v406_v41  ;;  %v248_v8 = vmax.f32 %v178_v6, 0.0 }
  0xdc   :  { %v187_v32 = vpop.f32.mrf.mxu0 }
  0xdd   :  { %v251_v1 = vmax.f32 %v193_v63, 0.0  ;;  %v188_v2 = vadd.f32 %v406_v41, %v187_v32 }
  0xde   :  { %v508_v33 = vpop.f32.mrf.mxu0 }
  0xdf   :  { %v203_v59 = vadd.f32 %v508_v33, %v406_v41  ;;  %v250_v4 = vmax.f32 %v188_v2, 0.0 }
  0xe0   :  { %v197_v34 = vpop.f32.mrf.mxu0 }
  0xe1   :  { %v253_v61 = vmax.f32 %v203_v59, 0.0  ;;  %v198_v62 = vadd.f32 %v406_v41, %v197_v34 }
  0xe2   :  { %v511_v35 = vpop.f32.mrf.mxu0 }
  0xe3   :  { %v213_v55 = vadd.f32 %v511_v35, %v406_v41  ;;  %v252_v0 = vmax.f32 %v198_v62, 0.0 }
  0xe4   :  { %v207_v36 = vpop.f32.mrf.mxu0 }
  0xe5   :  { %v255_v57 = vmax.f32 %v213_v55, 0.0  ;;  %v208_v58 = vadd.f32 %v406_v41, %v207_v36 }
  0xe6   :  { %v514_v37 = vpop.f32.mrf.mxu0 }
  0xe7   :  { %v223_v51 = vadd.f32 %v514_v37, %v406_v41  ;;  %v254_v60 = vmax.f32 %v208_v58, 0.0 }
  0xe8   :  { %v217_v38 = vpop.f32.mrf.mxu0 }
  0xe9   :  { %v257_v53 = vmax.f32 %v223_v51, 0.0  ;;  %v218_v54 = vadd.f32 %v406_v41, %v217_v38 }
  0xea   :  { %v517_v39 = vpop.f32.mrf.mxu0 }
  0xeb   :  { %v233_v47 = vadd.f32 %v517_v39, %v406_v41  ;;  %v256_v56 = vmax.f32 %v218_v54, 0.0 }
  0xec   :  { %v227_v40 = vpop.f32.mrf.mxu0 }
  0xed   :  { %v259_v49 = vmax.f32 %v233_v47, 0.0  ;;  %v228_v50 = vadd.f32 %v406_v41, %v227_v40 }
  0xee   :  { %v520_v42 = vpop.f32.mrf.mxu0 }
  0xef   :  { %v243_v43 = vadd.f32 %v520_v42, %v406_v41  ;;  %v258_v52 = vmax.f32 %v228_v50, 0.0 }
  0xf0   :  { %v237_v44 = vpop.f32.mrf.mxu0 }
  0xf1   :  { %v261_v45 = vmax.f32 %v243_v43, 0.0  ;;  %v238_v46 = vadd.f32 %v406_v41, %v237_v44 }
  0xf3   :  { %522 = vmatpush3.xpose.msk.msra.mxu1 %vm269_vm2, %v261_v45  ;;  %v260_v48 = vmax.f32 %v238_v46, 0.0 }
  0xf4   :  { %523 = vmatprep.subr.mxu1 %v583_v24 }
  0xf7   :  { %524 = vmatpush3.xpose.msk.msra.mxu1 %vm269_vm2, %v260_v48 }
  0xf8   :  { %525 = vmatprep.subr.mxu1 %v583_v24 }
  0xfb   :  { %526 = vmatpush3.xpose.msk.msra.mxu1 %vm269_vm2, %v259_v49 }
  0xfc   :  { %527 = vmatprep.subr.mxu1 %v583_v24 }
  0xff   :  { %528 = vmatpush3.xpose.msk.msra.mxu1 %vm269_vm2, %v258_v52 }
 0x100   :  { %529 = vmatprep.subr.mxu1 %v583_v24 }
 0x103   :  { %530 = vmatpush3.xpose.msk.msra.mxu1 %vm269_vm2, %v257_v53 }
 0x104   :  { %531 = vmatprep.subr.mxu1 %v583_v24 }
 0x107   :  { %532 = vmatpush3.xpose.msk.msra.mxu1 %vm269_vm2, %v256_v56 }
 0x108   :  { %533 = vmatprep.subr.mxu1 %v583_v24 }
 0x10b   :  { %534 = vmatpush3.xpose.msk.msra.mxu1 %vm269_vm2, %v255_v57 }
 0x10c   :  { %535 = vmatprep.subr.mxu1 %v583_v24 }
 0x10f   :  { %536 = vmatpush3.xpose.msk.msra.mxu1 %vm269_vm2, %v254_v60 }
 0x110   :  { %537 = vmatprep.subr.mxu1 %v583_v24 }
 0x113   :  { %538 = vmatpush3.xpose.msk.msra.mxu1 %vm269_vm2, %v253_v61 }
 0x114   :  { %539 = vmatprep.subr.mxu1 %v583_v24 }
 0x117   :  { %540 = vmatpush3.xpose.msk.msra.mxu1 %vm269_vm2, %v252_v0 }
 0x118   :  { %541 = vmatprep.subr.mxu1 %v583_v24 }
 0x11b   :  { %542 = vmatpush3.xpose.msk.msra.mxu1 %vm269_vm2, %v251_v1 }
 0x11c   :  { %543 = vmatprep.subr.mxu1 %v583_v24 }
 0x11f   :  { %544 = vmatpush3.xpose.msk.msra.mxu1 %vm269_vm2, %v250_v4 }
 0x120   :  { %545 = vmatprep.subr.mxu1 %v583_v24 }
 0x123   :  { %546 = vmatpush3.xpose.msk.msra.mxu1 %vm269_vm2, %v249_v5 }
 0x124   :  { %547 = vmatprep.subr.mxu1 %v583_v24 }
 0x127   :  { %548 = vmatpush3.xpose.msk.msra.mxu1 %vm269_vm2, %v248_v8 }
 0x128   :  { %549 = vmatprep.subr.mxu1 %v583_v24 }
 0x12b   :  { %550 = vmatpush3.xpose.msk.msra.mxu1 %vm269_vm2, %v247_v9 }
 0x12c   :  { %551 = vmatprep.subr.mxu1 %v583_v24 }
 0x12f   :  { %552 = vmatpush3.xpose.msk.msra.mxu1 %vm269_vm2, %v246_v11 }
 0x132   :  { %554 = vmatmul.mubr.msk.f32.vlgmr.msra.gmra.mxu1 %vm269_vm2, %v262_v12 }
 0x1f2   :  { %v387_v14 = vpop.f32.mrf.mxu1 }
 0x1f3   :  { %v388_v15 = vadd.f32 %v387_v14, %v267_v13 }
 0x1f4   :  { %v555_v16 = vpop.f32.mrf.mxu1 }
 0x1f5   :  { %391 = vst [vmem:[#allocation2] sm:$0x3] %v388_v15 }
 0x1f6   :  { %572 = shalt.err (!%p569_p4)
}
 0x1f7   :  { %401 = dma.vmem_to_hbm [thread:$0]  %s399_s18, 32, %s765_s5, [#allocation3]  }
 0x1f8   :  { %581 = dma.done.wait [#allocation3], 32  }
 0x1f9   :  { %582 = vsyncadd [#allocation3], 4294967264 }
 0x1fa   :  { %405 = vsyncpa [#allocation3], 1 }

</bundles_post_ra>
